<compile_context>
chip_gen: v5e
topology: v5e:2x2
jax: 0.10.0
libtpu: 0.0.40
codegen_flags: <defaults>
</compile_context>

<pallas_src>
import functools

import jax
import jax.numpy as jnp
from jax.experimental import pallas as pl
from jax.experimental.pallas import tpu as pltpu


CLASS_PAD = 128     # lane-dense output width (class_num and 2 both <= 128)
SUBLANE = 8         # batch padded to a sublane multiple


def _round_up(x, m):
    return (x + m - 1) // m * m


# ---------------------------------------------------------------------------
# Pallas kernel: both MLP heads back-to-back, no grid (whole arrays in VMEM).
#   cls   head: (B_pad, D) @ (D, 1024) -> +bias -> relu -> @ (1024, 128) -> +bias
#   prompt head: (B_pad, D) @ (D, 256) -> +bias -> relu -> @ (256, 128) -> +bias
# bf16 operands on the MXU, f32 accumulation (preferred_element_type), f32
# bias/ReLU on the VPU (v5e-safe).  Lane-dense unmasked (B_pad, 128) stores.
# ---------------------------------------------------------------------------
def _dual_head_kernel(xc_ref, xp_ref,
                      cw1_ref, cb1_ref, cw2_ref, cb2_ref,
                      pw1_ref, pb1_ref, pw2_ref, pb2_ref,
                      yc_ref, yp_ref):
    # cls head
    h = jnp.dot(xc_ref[...], cw1_ref[...],
                preferred_element_type=jnp.float32) + cb1_ref[...]
    h = jnp.maximum(h, 0.0)
    yc_ref[...] = jnp.dot(h.astype(jnp.bfloat16), cw2_ref[...],
                          preferred_element_type=jnp.float32) + cb2_ref[...]
    # prompt head
    h2 = jnp.dot(xp_ref[...], pw1_ref[...],
                 preferred_element_type=jnp.float32) + pb1_ref[...]
    h2 = jnp.maximum(h2, 0.0)
    yp_ref[...] = jnp.dot(h2.astype(jnp.bfloat16), pw2_ref[...],
                          preferred_element_type=jnp.float32) + pb2_ref[...]


def dual_head(x_cls, x_prompt, kp):
    """Single grid-less pallas_call; every operand is whole-array VMEM-resident."""
    b_pad, d = x_cls.shape
    hid_c = kp["cls_w1"].shape[1]
    hid_p = kp["p_w1"].shape[1]
    cpad = kp["cls_w2"].shape[1]

    operands = (x_cls, x_prompt,
                kp["cls_w1"], kp["cls_b1"], kp["cls_w2"], kp["cls_b2"],
                kp["p_w1"], kp["p_b1"], kp["p_w2"], kp["p_b2"])

    flops = 2 * b_pad * (d * hid_c + hid_c * cpad + d * hid_p + hid_p * cpad)
    bytes_accessed = (sum(int(a.size) * a.dtype.itemsize for a in operands)
                      + 2 * b_pad * cpad * 4)

    return pl.pallas_call(
        _dual_head_kernel,
        out_shape=(jax.ShapeDtypeStruct((b_pad, cpad), jnp.float32),
                   jax.ShapeDtypeStruct((b_pad, cpad), jnp.float32)),
        cost_estimate=pl.CostEstimate(flops=flops, transcendentals=0,
                                      bytes_accessed=bytes_accessed),
    )(*operands)


# ---------------------------------------------------------------------------
# Parameter construction (deterministic, xavier-normal like the PyTorch init)
# ---------------------------------------------------------------------------
def xavier_normal(key, shape):
    fan_in, fan_out = shape
    std = (2.0 / (fan_in + fan_out)) ** 0.5
    return std * jax.random.normal(key, shape, dtype=jnp.float32)


def make_params(key, vocab, embedding_dim, class_num):
    ks = jax.random.split(key, 10)
    return {
        # stand-in for the Longformer word embedding table / encoder output
        "emb_table": 0.02 * jax.random.normal(ks[0], (vocab, embedding_dim), jnp.float32),
        # cls head:  D -> 1024 -> class_num
        "cls_w1": xavier_normal(ks[1], (embedding_dim, 1024)),
        "cls_b1": (1.0 / embedding_dim ** 0.5)
        * jax.random.uniform(ks[2], (1024,), jnp.float32, -1.0, 1.0),
        "cls_w2": xavier_normal(ks[3], (1024, class_num)),
        "cls_b2": (1.0 / 1024 ** 0.5)
        * jax.random.uniform(ks[4], (class_num,), jnp.float32, -1.0, 1.0),
        # prompt head:  D -> 256 -> 2
        "p_w1": xavier_normal(ks[5], (embedding_dim, 256)),
        "p_b1": (1.0 / embedding_dim ** 0.5)
        * jax.random.uniform(ks[6], (256,), jnp.float32, -1.0, 1.0),
        "p_w2": xavier_normal(ks[7], (256, 2)),
        "p_b2": (1.0 / 256 ** 0.5)
        * jax.random.uniform(ks[8], (2,), jnp.float32, -1.0, 1.0),
    }


def prepare_kernel_params(params, *, cpad=CLASS_PAD):
    """One-time packing of the head weights into kernel layout.

    Each head keeps its natural hidden width (1024 / 256); only the tiny output
    dims (class_num / 2) are zero-padded to a lane-dense 128 so the final
    stores are unmasked (padding columns are exactly zero-weight + zero-bias,
    hence sliced off losslessly in the wrapper).  Weights are cast to bf16
    (halves the dominant weight-DMA bytes); biases stay f32, shaped (1, N).
    """
    class_num = params["cls_w2"].shape[1]
    assert class_num <= cpad and params["p_w2"].shape[1] <= cpad

    def pad_cols(x, n):
        return jnp.pad(x, [(0, 0)] * (x.ndim - 1) + [(0, n - x.shape[-1])])

    return {
        "cls_w1": params["cls_w1"].astype(jnp.bfloat16),
        "cls_b1": params["cls_b1"].reshape(1, -1).astype(jnp.float32),
        "cls_w2": pad_cols(params["cls_w2"], cpad).astype(jnp.bfloat16),
        "cls_b2": pad_cols(params["cls_b2"].reshape(1, -1), cpad).astype(jnp.float32),
        "p_w1": params["p_w1"].astype(jnp.bfloat16),
        "p_b1": params["p_b1"].reshape(1, -1).astype(jnp.float32),
        "p_w2": pad_cols(params["p_w2"], cpad).astype(jnp.bfloat16),
        "p_b2": pad_cols(params["p_b2"].reshape(1, -1), cpad).astype(jnp.float32),
    }


# ---------------------------------------------------------------------------
# Forward pass
# ---------------------------------------------------------------------------
@functools.partial(jax.jit, static_argnames=("class_num",))
def model_forward(params, kparams, sentence, mask, prompt_mask_idx, *, class_num):
    # `mask` is unused by the stubbed encoder (needs the real Longformer stack);
    # kept in the signature for parity with the PyTorch model.
    del mask
    b = sentence.shape[0]
    b_pad = _round_up(b, SUBLANE)

    # Gather only the 2*B pooled rows (the (B, S, D) hidden-state tensor is
    # never built); pad the batch to a sublane multiple and feed bf16 rows.
    ids_cls = sentence[:, 0]
    ids_prompt = sentence[jnp.arange(b), prompt_mask_idx]
    x_cls = jnp.pad(params["emb_table"][ids_cls],
                    ((0, b_pad - b), (0, 0))).astype(jnp.bfloat16)
    x_prompt = jnp.pad(params["emb_table"][ids_prompt],
                       ((0, b_pad - b), (0, 0))).astype(jnp.bfloat16)

    y_cls, y_prompt = dual_head(x_cls, x_prompt, kparams)
    return y_cls[:b, :class_num], y_prompt[:b, :2]


# pure-JAX f32 reference mirroring the original module's semantics
def model_forward_ref(params, sentence, mask, prompt_mask_idx):
    del mask
    b = sentence.shape[0]
    embed = params["emb_table"][sentence]              # (B, S, D) last_hidden_state stand-in
    pooled1 = embed[:, 0]
    pooled2 = embed[jnp.arange(b), prompt_mask_idx]

    def head(x, w1, b1, w2, b2):
        return jnp.maximum(x @ w1 + b1, 0.0) @ w2 + b2

    return (head(pooled1, params["cls_w1"], params["cls_b1"],
                 params["cls_w2"], params["cls_b2"]),
            head(pooled2, params["p_w1"], params["p_b1"],
                 params["p_w2"], params["p_b2"]))


if __name__ == "__main__":
    B, S, D = 2, 8, 128          # batch, seq_len, embedding_dim (lane-aligned stand-in)
    VOCAB, CLASS_NUM = 50, 4

    key = jax.random.PRNGKey(0)
    k_param, k_tok, k_idx = jax.random.split(key, 3)

    params = make_params(k_param, VOCAB, D, CLASS_NUM)
    kparams = prepare_kernel_params(params)            # one-time bf16 / lane-pad packing

    sentence = jax.random.randint(k_tok, (B, S), 0, VOCAB, dtype=jnp.int32)
    mask = jnp.ones((B, S), dtype=jnp.int32)
    prompt_mask_idx = jax.random.randint(k_idx, (B,), 1, S, dtype=jnp.int32)

    y_hat, y_hat_prompt = model_forward(params, kparams, sentence, mask,
                                        prompt_mask_idx, class_num=CLASS_NUM)
    jax.block_until_ready((y_hat, y_hat_prompt))

    ref1, ref2 = model_forward_ref(params, sentence, mask, prompt_mask_idx)
    assert y_hat.shape == (B, CLASS_NUM) and y_hat_prompt.shape == (B, 2)
    # bf16 inputs/weights vs f32 reference -> looser tolerance
    assert jnp.allclose(y_hat, ref1, atol=2e-2, rtol=2e-2)
    assert jnp.allclose(y_hat_prompt, ref2, atol=2e-2, rtol=2e-2)

    print("KERNEL_OK")
</pallas_src>

<mosaic_0001>
module attributes {stable_mosaic.version = 11 : i64} {
  func.func @_dual_head_kernel(%arg0: memref<8x128xbf16, #tpu.memory_space<vmem>>, %arg1: memref<8x128xbf16, #tpu.memory_space<vmem>>, %arg2: memref<128x1024xbf16, #tpu.memory_space<vmem>>, %arg3: memref<1x1024xf32, #tpu.memory_space<vmem>>, %arg4: memref<1024x128xbf16, #tpu.memory_space<vmem>>, %arg5: memref<1x128xf32, #tpu.memory_space<vmem>>, %arg6: memref<128x256xbf16, #tpu.memory_space<vmem>>, %arg7: memref<1x256xf32, #tpu.memory_space<vmem>>, %arg8: memref<256x128xbf16, #tpu.memory_space<vmem>>, %arg9: memref<1x128xf32, #tpu.memory_space<vmem>>, %arg10: memref<8x128xf32, #tpu.memory_space<vmem>>, %arg11: memref<8x128xf32, #tpu.memory_space<vmem>>) attributes {dimension_semantics = [], scalar_prefetch = 0 : i64, scratch_operands = 0 : i64, tpu.core_type = #tpu.core_type<tc>} {
    %c0 = arith.constant 0 : index
    %c0_0 = arith.constant 0 : index
    %0 = vector.load %arg0[%c0, %c0_0] : memref<8x128xbf16, #tpu.memory_space<vmem>>, vector<8x128xbf16>
    %c0_1 = arith.constant 0 : index
    %c0_2 = arith.constant 0 : index
    %1 = vector.load %arg2[%c0_1, %c0_2] : memref<128x1024xbf16, #tpu.memory_space<vmem>>, vector<128x1024xbf16>
    %cst = arith.constant dense<0.000000e+00> : vector<8x1024xf32>
    %2 = tpu.matmul %0, %1, %cst {dimension_numbers = #tpu.dot_dimension_numbers<[1], [0], [0], [1], [0, 0, 1, 1], [], []>} : vector<8x128xbf16>, vector<128x1024xbf16>, vector<8x1024xf32> -> vector<8x1024xf32>
    %c0_3 = arith.constant 0 : index
    %c0_4 = arith.constant 0 : index
    %3 = vector.load %arg3[%c0_3, %c0_4] : memref<1x1024xf32, #tpu.memory_space<vmem>>, vector<1x1024xf32>
    %4 = vector.broadcast %3 : vector<1x1024xf32> to vector<8x1024xf32>
    %5 = arith.addf %2, %4 : vector<8x1024xf32>
    %cst_5 = arith.constant 0.000000e+00 : f32
    %6 = vector.broadcast %cst_5 : f32 to vector<8x1024xf32>
    %7 = arith.maximumf %5, %6 : vector<8x1024xf32>
    %8 = arith.truncf %7 : vector<8x1024xf32> to vector<8x1024xbf16>
    %c0_6 = arith.constant 0 : index
    %c0_7 = arith.constant 0 : index
    %9 = vector.load %arg4[%c0_6, %c0_7] : memref<1024x128xbf16, #tpu.memory_space<vmem>>, vector<1024x128xbf16>
    %cst_8 = arith.constant dense<0.000000e+00> : vector<8x128xf32>
    %10 = tpu.matmul %8, %9, %cst_8 {dimension_numbers = #tpu.dot_dimension_numbers<[1], [0], [0], [1], [0, 0, 1, 1], [], []>} : vector<8x1024xbf16>, vector<1024x128xbf16>, vector<8x128xf32> -> vector<8x128xf32>
    %c0_9 = arith.constant 0 : index
    %c0_10 = arith.constant 0 : index
    %11 = vector.load %arg5[%c0_9, %c0_10] : memref<1x128xf32, #tpu.memory_space<vmem>>, vector<1x128xf32>
    %12 = vector.broadcast %11 : vector<1x128xf32> to vector<8x128xf32>
    %13 = arith.addf %10, %12 : vector<8x128xf32>
    %c0_11 = arith.constant 0 : index
    %c0_12 = arith.constant 0 : index
    %14 = vector.load %arg10[%c0_11, %c0_12] : memref<8x128xf32, #tpu.memory_space<vmem>>, vector<8x128xf32>
    tpu.vector_store %arg10[%c0_11, %c0_12], %13 {strides = array<i32>} : memref<8x128xf32, #tpu.memory_space<vmem>>, vector<8x128xf32>,
    %c0_13 = arith.constant 0 : index
    %c0_14 = arith.constant 0 : index
    %15 = vector.load %arg1[%c0_13, %c0_14] : memref<8x128xbf16, #tpu.memory_space<vmem>>, vector<8x128xbf16>
    %c0_15 = arith.constant 0 : index
    %c0_16 = arith.constant 0 : index
    %16 = vector.load %arg6[%c0_15, %c0_16] : memref<128x256xbf16, #tpu.memory_space<vmem>>, vector<128x256xbf16>
    %cst_17 = arith.constant dense<0.000000e+00> : vector<8x256xf32>
    %17 = tpu.matmul %15, %16, %cst_17 {dimension_numbers = #tpu.dot_dimension_numbers<[1], [0], [0], [1], [0, 0, 1, 1], [], []>} : vector<8x128xbf16>, vector<128x256xbf16>, vector<8x256xf32> -> vector<8x256xf32>
    %c0_18 = arith.constant 0 : index
    %c0_19 = arith.constant 0 : index
    %18 = vector.load %arg7[%c0_18, %c0_19] : memref<1x256xf32, #tpu.memory_space<vmem>>, vector<1x256xf32>
    %19 = vector.broadcast %18 : vector<1x256xf32> to vector<8x256xf32>
    %20 = arith.addf %17, %19 : vector<8x256xf32>
    %cst_20 = arith.constant 0.000000e+00 : f32
    %21 = vector.broadcast %cst_20 : f32 to vector<8x256xf32>
    %22 = arith.maximumf %20, %21 : vector<8x256xf32>
    %23 = arith.truncf %22 : vector<8x256xf32> to vector<8x256xbf16>
    %c0_21 = arith.constant 0 : index
    %c0_22 = arith.constant 0 : index
    %24 = vector.load %arg8[%c0_21, %c0_22] : memref<256x128xbf16, #tpu.memory_space<vmem>>, vector<256x128xbf16>
    %cst_23 = arith.constant dense<0.000000e+00> : vector<8x128xf32>
    %25 = tpu.matmul %23, %24, %cst_23 {dimension_numbers = #tpu.dot_dimension_numbers<[1], [0], [0], [1], [0, 0, 1, 1], [], []>} : vector<8x256xbf16>, vector<256x128xbf16>, vector<8x128xf32> -> vector<8x128xf32>
    %c0_24 = arith.constant 0 : index
    %c0_25 = arith.constant 0 : index
    %26 = vector.load %arg9[%c0_24, %c0_25] : memref<1x128xf32, #tpu.memory_space<vmem>>, vector<1x128xf32>
    %27 = vector.broadcast %26 : vector<1x128xf32> to vector<8x128xf32>
    %28 = arith.addf %25, %27 : vector<8x128xf32>
    %c0_26 = arith.constant 0 : index
    %c0_27 = arith.constant 0 : index
    %29 = vector.load %arg11[%c0_26, %c0_27] : memref<8x128xf32, #tpu.memory_space<vmem>>, vector<8x128xf32>
    tpu.vector_store %arg11[%c0_26, %c0_27], %28 {strides = array<i32>} : memref<8x128xf32, #tpu.memory_space<vmem>>, vector<8x128xf32>,
    return
  }
}

</mosaic_0001>

<bundles_post_ra>
// kernel: model_forward.1
= control target key start
LH: loop header
LB: loop body
LE: loop exit
PB: predicated region body
PF: predicated region fallthrough
CT: control target
= control target key end

     0   :  { %17 = vsyncpa [#allocation3], 0  ;;  %s3067_s0 = inlined_call_operand.vmem [shape: bf16[8,128], index: 0, kind: input, shape index: {}]   ;;  %s3068_s1 = inlined_call_operand.vmem [shape: bf16[8,128], index: 1, kind: input, shape index: {}]   ;;  %s3069_s2 = inlined_call_operand.vmem [shape: bf16[128,1024], index: 2, kind: input, shape index: {}]   ;;  %s3070_s3 = inlined_call_operand.vmem [shape: f32[1,1024], index: 3, kind: input, shape index: {}]   ;;  %s3071_s4 = inlined_call_operand.vmem [shape: bf16[1024,128], index: 4, kind: input, shape index: {}]   ;;  %s3072_s5 = inlined_call_operand.vmem [shape: f32[1,128], index: 5, kind: input, shape index: {}]   ;;  %s3073_s6 = inlined_call_operand.hbm [shape: bf16[128,256], index: 6, kind: input, shape index: {}]   ;;  %s3074_s7 = inlined_call_operand.vmem [shape: f32[1,256], index: 7, kind: input, shape index: {}]   ;;  %s3075_s8 = inlined_call_operand.hbm [shape: bf16[256,128], index: 8, kind: input, shape index: {}]   ;;  %s3076_s9 = inlined_call_operand.vmem [shape: f32[1,128], index: 9, kind: input, shape index: {}]   ;;  %s3077_s10 = inlined_call_operand.vmem [shape: f32[8,128], index: 10, kind: output, shape index: {0}]   ;;  %s3078_s11 = inlined_call_operand.vmem [shape: f32[8,128], index: 11, kind: output, shape index: {1}]  }
   0x1   :  { %s35_s19 = sshll.u32 %s3073_s6, 4  ;;  %s36_s19 = int_to_ptr.hbm [resolvable:$true] %s35_s19 }
   0x2   :  { %18 = vsyncpa [#allocation5], 0  ;;  %s2375_s20 = smov [#allocation2]   ;;  %s50_s24 = sshll.u32 %s3075_s8, 4  ;;  %s51_s24 = int_to_ptr.hbm [resolvable:$true] %s50_s24 }
   0x3   :  { %s37_s21 = sshll.u32 %s2375_s20, 4  ;;  %s2376_s25 = smov 128   ;;  %s38_s21 = int_to_ptr.vmem [resolvable:$true] %s37_s21 }
   0x4   :  { %s2377_s26 = smov 8   ;;  %s2378_s27 = smov [#allocation4]  }
   0x5   :  { %43 = dma.hbm_to_vmem [thread:$0]  %s36_s19, 2048, %s38_s21, [#allocation3], %s2376_s25, %s2376_s25, %s2377_s26  }
   0x6   :  { %s52_s28 = sshll.u32 %s2378_s27, 4  ;;  %s2379_s29 = smov 64   ;;  %s53_s28 = int_to_ptr.vmem [resolvable:$true] %s52_s28 }
   0x7   :  { %s2380_s30 = smov 4  }
   0x8   :  { %58 = dma.hbm_to_vmem [thread:$0]  %s51_s24, 2048, %s53_s28, [#allocation5], %s2379_s29, %s2379_s29, %s2380_s30  }
   0x9   :  { %2371 = dma.done.wait [#allocation3], 2048  }
   0xa   :  { %2372 = vsyncadd [#allocation3], 4294965248 }
   0xb   :  { %2373 = dma.done.wait [#allocation5], 2048  }
   0xc   :  { %2374 = vsyncadd [#allocation5], 4294965248  ;;  %v1741_v0 = vld [vmem:[%s3069_s2 + $0x1c0] sm:$0xf]  ;;  %v2211_v2 = vld [vmem:[%s3069_s2 + $0x1c4] sm:$0xf] }
   0xd   :  { %v2215_v1 = vld [vmem:[%s3069_s2 + $0x1dc] sm:$0xf0]  ;;  %v1743_v4 = vld [vmem:[%s3069_s2 + $0x1e0] sm:$0xf0]  ;;  %v1749_v5 = vld [vmem:[%s3069_s2 + $0x1c8] sm:$0xf] }
   0xe   :  { %v1742_v3 = vor.u32 %v2215_v1, %v1741_v0  ;;  %v2216_v6 = vld [vmem:[%s3069_s2 + $0x1e4] sm:$0xf0]  ;;  %v1746_v7 = vor.u32 %v2211_v2, %v1743_v4  ;;  %v2212_v9 = vld [vmem:[%s3069_s2 + $0x1cc] sm:$0xf]  ;;  %v1709_v11 = vld [vmem:[%s3069_s2 + $0x180] sm:$0xf] }
   0xf   :  { %v1750_v8 = vor.u32 %v2216_v6, %v1749_v5  ;;  %v1751_v10 = vld [vmem:[%s3069_s2 + $0x1e8] sm:$0xf0]  ;;  %v2207_v13 = vld [vmem:[%s3069_s2 + $0x19c] sm:$0xf0]  ;;  %v2203_v14 = vld [vmem:[%s3069_s2 + $0x184] sm:$0xf] }
  0x10   :  { %472 = vmatpush.bf16.msra.mxu0 %v1742_v3  ;;  %v1754_v12 = vor.u32 %v2212_v9, %v1751_v10  ;;  %v1711_v15 = vld [vmem:[%s3069_s2 + $0x1a0] sm:$0xf0]  ;;  %485 = vmatpush.bf16.msra.mxu1 %v1746_v7  ;;  %v1710_v16 = vor.u32 %v2207_v13, %v1709_v11  ;;  %v1717_v18 = vld [vmem:[%s3069_s2 + $0x188] sm:$0xf]  ;;  %v2204_v20 = vld [vmem:[%s3069_s2 + $0x18c] sm:$0xf] }
  0x11   :  { %498 = vmatpush.bf16.msra.mxu2 %v1750_v8  ;;  %v1714_v17 = vor.u32 %v2203_v14, %v1711_v15  ;;  %v2208_v19 = vld [vmem:[%s3069_s2 + $0x1a4] sm:$0xf0]  ;;  %v1719_v22 = vld [vmem:[%s3069_s2 + $0x1a8] sm:$0xf0]  ;;  %v1677_v23 = vld [vmem:[%s3069_s2 + $0x140] sm:$0xf] }
  0x12   :  { %511 = vmatpush.bf16.msra.mxu3 %v1754_v12  ;;  %v1718_v21 = vor.u32 %v2208_v19, %v1717_v18  ;;  %v2199_v24 = vld [vmem:[%s3069_s2 + $0x15c] sm:$0xf0]  ;;  %v1722_v25 = vor.u32 %v2204_v20, %v1719_v22  ;;  %v2195_v26 = vld [vmem:[%s3069_s2 + $0x144] sm:$0xf]  ;;  %v1685_v28 = vld [vmem:[%s3069_s2 + $0x148] sm:$0xf] }
  0x13   :  { %v1679_v27 = vld [vmem:[%s3069_s2 + $0x160] sm:$0xf0]  ;;  %v1678_v29 = vor.u32 %v2199_v24, %v1677_v23  ;;  %v2200_v30 = vld [vmem:[%s3069_s2 + $0x164] sm:$0xf0]  ;;  %v2196_v31 = vld [vmem:[%s3069_s2 + $0x14c] sm:$0xf] }
  0x14   :  { %473 = vmatpush.bf16.msra.mxu0 %v1710_v16  ;;  %v1687_v32 = vld [vmem:[%s3069_s2 + $0x168] sm:$0xf0]  ;;  %486 = vmatpush.bf16.msra.mxu1 %v1714_v17  ;;  %v1682_v33 = vor.u32 %v2195_v26, %v1679_v27  ;;  %v1686_v34 = vor.u32 %v2200_v30, %v1685_v28  ;;  %v1645_v35 = vld [vmem:[%s3069_s2 + $0x100] sm:$0xf]  ;;  %v2187_v37 = vld [vmem:[%s3069_s2 + $0x104] sm:$0xf] }
  0x15   :  { %499 = vmatpush.bf16.msra.mxu2 %v1718_v21  ;;  %v2191_v36 = vld [vmem:[%s3069_s2 + $0x11c] sm:$0xf0]  ;;  %v1690_v38 = vor.u32 %v2196_v31, %v1687_v32  ;;  %v1647_v39 = vld [vmem:[%s3069_s2 + $0x120] sm:$0xf0]  ;;  %v1653_v40 = vld [vmem:[%s3069_s2 + $0x108] sm:$0xf] }
  0x16   :  { %512 = vmatpush.bf16.msra.mxu3 %v1722_v25  ;;  %v2192_v41 = vld [vmem:[%s3069_s2 + $0x124] sm:$0xf0]  ;;  %v2188_v42 = vld [vmem:[%s3069_s2 + $0x10c] sm:$0xf]  ;;  %v1646_v44 = vor.u32 %v2191_v36, %v1645_v35  ;;  %v1650_v45 = vor.u32 %v2187_v37, %v1647_v39  ;;  %v1613_v47 = vld [vmem:[%s3069_s2 + $0xc0] sm:$0xf] }
  0x17   :  { %v1655_v43 = vld [vmem:[%s3069_s2 + $0x128] sm:$0xf0]  ;;  %v1654_v46 = vor.u32 %v2192_v41, %v1653_v40  ;;  %v2183_v48 = vld [vmem:[%s3069_s2 + $0xdc] sm:$0xf0]  ;;  %v2179_v49 = vld [vmem:[%s3069_s2 + $0xc4] sm:$0xf] }
  0x18   :  { %474 = vmatpush.bf16.msra.mxu0 %v1678_v29  ;;  %487 = vmatpush.bf16.msra.mxu1 %v1682_v33  ;;  %v1658_v50 = vor.u32 %v2188_v42, %v1655_v43  ;;  %v1615_v51 = vld [vmem:[%s3069_s2 + $0xe0] sm:$0xf0]  ;;  %v1621_v52 = vld [vmem:[%s3069_s2 + $0xc8] sm:$0xf]  ;;  %v2180_v54 = vld [vmem:[%s3069_s2 + $0xcc] sm:$0xf]  ;;  %v1614_v56 = vor.u32 %v2183_v48, %v1613_v47 }
  0x19   :  { %500 = vmatpush.bf16.msra.mxu2 %v1686_v34  ;;  %v2184_v53 = vld [vmem:[%s3069_s2 + $0xe4] sm:$0xf0]  ;;  %v1623_v55 = vld [vmem:[%s3069_s2 + $0xe8] sm:$0xf0]  ;;  %v1618_v57 = vor.u32 %v2179_v49, %v1615_v51  ;;  %v1581_v59 = vld [vmem:[%s3069_s2 + $0x80] sm:$0xf] }
  0x1a   :  { %513 = vmatpush.bf16.msra.mxu3 %v1690_v38  ;;  %v1622_v58 = vor.u32 %v2184_v53, %v1621_v52  ;;  %v2175_v60 = vld [vmem:[%s3069_s2 + $0x9c] sm:$0xf0]  ;;  %v2171_v61 = vld [vmem:[%s3069_s2 + $0x84] sm:$0xf]  ;;  %v1626_v62 = vor.u32 %v2180_v54, %v1623_v55  ;;  %v1589_v0 = vld [vmem:[%s3069_s2 + $0x88] sm:$0xf] }
  0x1b   :  { %v1583_v63 = vld [vmem:[%s3069_s2 + $0xa0] sm:$0xf0]  ;;  %v2176_v1 = vld [vmem:[%s3069_s2 + $0xa4] sm:$0xf0]  ;;  %v2172_v2 = vld [vmem:[%s3069_s2 + $0x8c] sm:$0xf]  ;;  %v1582_v4 = vor.u32 %v2175_v60, %v1581_v59 }
  0x1c   :  { %475 = vmatpush.bf16.msra.mxu0 %v1646_v44  ;;  %488 = vmatpush.bf16.msra.mxu1 %v1650_v45  ;;  %v1591_v3 = vld [vmem:[%s3069_s2 + $0xa8] sm:$0xf0]  ;;  %v1586_v5 = vor.u32 %v2171_v61, %v1583_v63  ;;  %v1590_v6 = vor.u32 %v2176_v1, %v1589_v0  ;;  %v1549_v7 = vld [vmem:[%s3069_s2 + $0x40] sm:$0xf]  ;;  %v2163_v9 = vld [vmem:[%s3069_s2 + $0x44] sm:$0xf] }
  0x1d   :  { %501 = vmatpush.bf16.msra.mxu2 %v1654_v46  ;;  %v2167_v8 = vld [vmem:[%s3069_s2 + $0x5c] sm:$0xf0]  ;;  %v1594_v10 = vor.u32 %v2172_v2, %v1591_v3  ;;  %v1551_v11 = vld [vmem:[%s3069_s2 + $0x60] sm:$0xf0]  ;;  %v1557_v12 = vld [vmem:[%s3069_s2 + $0x48] sm:$0xf] }
  0x1e   :  { %514 = vmatpush.bf16.msra.mxu3 %v1658_v50  ;;  %v2168_v13 = vld [vmem:[%s3069_s2 + $0x64] sm:$0xf0]  ;;  %v2164_v14 = vld [vmem:[%s3069_s2 + $0x4c] sm:$0xf]  ;;  %v1550_v16 = vor.u32 %v2167_v8, %v1549_v7  ;;  %v1517_v17 = vld [vmem:[%s3069_s2] sm:$0xf]  ;;  %v1554_v19 = vor.u32 %v2163_v9, %v1551_v11 }
  0x1f   :  { %v1559_v15 = vld [vmem:[%s3069_s2 + $0x68] sm:$0xf0]  ;;  %v2159_v18 = vld [vmem:[%s3069_s2 + $0x1c] sm:$0xf0]  ;;  %v1558_v20 = vor.u32 %v2168_v13, %v1557_v12  ;;  %v2155_v21 = vld [vmem:[%s3069_s2 + $0x4] sm:$0xf] }
  0x20   :  { %476 = vmatpush.bf16.msra.mxu0 %v1614_v56  ;;  %489 = vmatpush.bf16.msra.mxu1 %v1618_v57  ;;  %v1519_v22 = vld [vmem:[%s3069_s2 + $0x20] sm:$0xf0]  ;;  %v1525_v23 = vld [vmem:[%s3069_s2 + $0x8] sm:$0xf]  ;;  %v1562_v24 = vor.u32 %v2164_v14, %v1559_v15  ;;  %v1757_v26 = vld [vmem:[%s3069_s2 + $0x1d0] sm:$0xf]  ;;  %v1518_v31 = vor.u32 %v2159_v18, %v1517_v17 }
  0x21   :  { %502 = vmatpush.bf16.msra.mxu2 %v1622_v58  ;;  %v2160_v25 = vld [vmem:[%s3069_s2 + $0x24] sm:$0xf0]  ;;  %v2217_v27 = vld [vmem:[%s3069_s2 + $0x1ec] sm:$0xf0]  ;;  %v2213_v28 = vld [vmem:[%s3069_s2 + $0x1d4] sm:$0xf]  ;;  %v1522_v35 = vor.u32 %v2155_v21, %v1519_v22 }
  0x22   :  { %515 = vmatpush.bf16.msra.mxu3 %v1626_v62  ;;  %v1759_v29 = vld [vmem:[%s3069_s2 + $0x1f0] sm:$0xf0]  ;;  %v1765_v30 = vld [vmem:[%s3069_s2 + $0x1d8] sm:$0xf]  ;;  %v2156_v33 = vld [vmem:[%s3069_s2 + $0xc] sm:$0xf]  ;;  %v1526_v36 = vor.u32 %v2160_v25, %v1525_v23  ;;  %v1758_v39 = vor.u32 %v2217_v27, %v1757_v26 }
  0x23   :  { %v2218_v32 = vld [vmem:[%s3069_s2 + $0x1f4] sm:$0xf0]  ;;  %v1527_v34 = vld [vmem:[%s3069_s2 + $0x28] sm:$0xf0]  ;;  %v2214_v37 = vld [vmem:[%s3069_s2 + $0x1dc] sm:$0xf]  ;;  %v1762_v40 = vor.u32 %v2213_v28, %v1759_v29 }
  0x24   :  { %477 = vmatpush.bf16.msra.mxu0 %v1582_v4  ;;  %490 = vmatpush.bf16.msra.mxu1 %v1586_v5  ;;  %v1767_v38 = vld [vmem:[%s3069_s2 + $0x1f8] sm:$0xf0]  ;;  %v1725_v41 = vld [vmem:[%s3069_s2 + $0x190] sm:$0xf]  ;;  %v1766_v42 = vor.u32 %v2218_v32, %v1765_v30  ;;  %v1530_v43 = vor.u32 %v2156_v33, %v1527_v34  ;;  %v2205_v45 = vld [vmem:[%s3069_s2 + $0x194] sm:$0xf] }
  0x25   :  { %503 = vmatpush.bf16.msra.mxu2 %v1590_v6  ;;  %v2209_v44 = vld [vmem:[%s3069_s2 + $0x1ac] sm:$0xf0]  ;;  %v1727_v46 = vld [vmem:[%s3069_s2 + $0x1b0] sm:$0xf0]  ;;  %v1770_v47 = vor.u32 %v2214_v37, %v1767_v38  ;;  %v1733_v48 = vld [vmem:[%s3069_s2 + $0x198] sm:$0xf] }
  0x26   :  { %516 = vmatpush.bf16.msra.mxu3 %v1594_v10  ;;  %v2210_v49 = vld [vmem:[%s3069_s2 + $0x1b4] sm:$0xf0]  ;;  %v2684_v50 = vld [vmem:[%s3067_s0] sm:$0xf]  ;;  %v2206_v51 = vld [vmem:[%s3069_s2 + $0x19c] sm:$0xf]  ;;  %v1726_v53 = vor.u32 %v2209_v44, %v1725_v41  ;;  %v1730_v54 = vor.u32 %v2205_v45, %v1727_v46 }
  0x27   :  { %v1735_v52 = vld [vmem:[%s3069_s2 + $0x1b8] sm:$0xf0]  ;;  %v1693_v55 = vld [vmem:[%s3069_s2 + $0x150] sm:$0xf]  ;;  %v1734_v56 = vor.u32 %v2210_v49, %v1733_v48  ;;  %v2197_v58 = vld [vmem:[%s3069_s2 + $0x154] sm:$0xf] }
  0x28   :  { %478 = vmatpush.bf16.msra.mxu0 %v1550_v16  ;;  %491 = vmatpush.bf16.msra.mxu1 %v1554_v19  ;;  %v2201_v57 = vld [vmem:[%s3069_s2 + $0x16c] sm:$0xf0]  ;;  %v1695_v59 = vld [vmem:[%s3069_s2 + $0x170] sm:$0xf0]  ;;  %v1738_v60 = vor.u32 %v2206_v51, %v1735_v52  ;;  %v1701_v61 = vld [vmem:[%s3069_s2 + $0x158] sm:$0xf] }
  0x29   :  { %504 = vmatpush.bf16.msra.mxu2 %v1558_v20  ;;  %v2202_v62 = vld [vmem:[%s3069_s2 + $0x174] sm:$0xf0]  ;;  %v2198_v63 = vld [vmem:[%s3069_s2 + $0x15c] sm:$0xf]  ;;  %v1694_v1 = vor.u32 %v2201_v57, %v1693_v55  ;;  %v1698_v2 = vor.u32 %v2197_v58, %v1695_v59  ;;  %v1661_v3 = vld [vmem:[%s3069_s2 + $0x110] sm:$0xf] }
  0x2a   :  { %517 = vmatpush.bf16.msra.mxu3 %v1562_v24  ;;  %v1703_v0 = vld [vmem:[%s3069_s2 + $0x178] sm:$0xf0]  ;;  %v1702_v4 = vor.u32 %v2202_v62, %v1701_v61  ;;  %v2193_v5 = vld [vmem:[%s3069_s2 + $0x12c] sm:$0xf0]  ;;  %v2189_v6 = vld [vmem:[%s3069_s2 + $0x114] sm:$0xf] }
  0x2b   :  { %v1663_v7 = vld [vmem:[%s3069_s2 + $0x130] sm:$0xf0]  ;;  %v1706_v8 = vor.u32 %v2198_v63, %v1703_v0  ;;  %v1669_v9 = vld [vmem:[%s3069_s2 + $0x118] sm:$0xf]  ;;  %v2190_v11 = vld [vmem:[%s3069_s2 + $0x11c] sm:$0xf]  ;;  %v1662_v13 = vor.u32 %v2193_v5, %v1661_v3 }
  0x2c   :  { %479 = vmatpush.bf16.msra.mxu0 %v1518_v31  ;;  %492 = vmatpush.bf16.msra.mxu1 %v1522_v35  ;;  %v2194_v10 = vld [vmem:[%s3069_s2 + $0x134] sm:$0xf0]  ;;  %v1671_v12 = vld [vmem:[%s3069_s2 + $0x138] sm:$0xf0]  ;;  %v1666_v14 = vor.u32 %v2189_v6, %v1663_v7  ;;  %v1629_v15 = vld [vmem:[%s3069_s2 + $0xd0] sm:$0xf] }
  0x2d   :  { %505 = vmatpush.bf16.msra.mxu2 %v1526_v36  ;;  %v1670_v16 = vor.u32 %v2194_v10, %v1669_v9  ;;  %v2185_v17 = vld [vmem:[%s3069_s2 + $0xec] sm:$0xf0]  ;;  %v2181_v18 = vld [vmem:[%s3069_s2 + $0xd4] sm:$0xf]  ;;  %v1674_v20 = vor.u32 %v2190_v11, %v1671_v12  ;;  %v1637_v21 = vld [vmem:[%s3069_s2 + $0xd8] sm:$0xf] }
  0x2e   :  { %518 = vmatpush.bf16.msra.mxu3 %v1530_v43  ;;  %v1631_v19 = vld [vmem:[%s3069_s2 + $0xf0] sm:$0xf0]  ;;  %v2186_v22 = vld [vmem:[%s3069_s2 + $0xf4] sm:$0xf0]  ;;  %v2182_v23 = vld [vmem:[%s3069_s2 + $0xdc] sm:$0xf]  ;;  %v1630_v25 = vor.u32 %v2185_v17, %v1629_v15 }
  0x2f   :  { %480 = vmatmul.bf16.vlgmr.msra.gmra.mxu0 %v2684_v50  ;;  %493 = vmatmul.bf16.vlgmr.msra.gmra.mxu1 %v2684_v50  ;;  %v1639_v24 = vld [vmem:[%s3069_s2 + $0xf8] sm:$0xf0]  ;;  %v1634_v26 = vor.u32 %v2181_v18, %v1631_v19  ;;  %v1597_v27 = vld [vmem:[%s3069_s2 + $0x90] sm:$0xf]  ;;  %v2173_v29 = vld [vmem:[%s3069_s2 + $0x94] sm:$0xf]  ;;  %v1638_v30 = vor.u32 %v2186_v22, %v1637_v21 }
  0x30   :  { %524 = vmatpush.bf16.msrb.mxu0 %v1758_v39  ;;  %537 = vmatpush.bf16.msrb.mxu1 %v1762_v40  ;;  %v2177_v28 = vld [vmem:[%s3069_s2 + $0xac] sm:$0xf0]  ;;  %v1599_v31 = vld [vmem:[%s3069_s2 + $0xb0] sm:$0xf0]  ;;  %v1642_v32 = vor.u32 %v2182_v23, %v1639_v24  ;;  %v1605_v33 = vld [vmem:[%s3069_s2 + $0x98] sm:$0xf] }
  0x31   :  { %550 = vmatpush.bf16.msrb.mxu2 %v1766_v42  ;;  %519 = vmatmul.bf16.vlgmr.msra.gmra.mxu3 %v2684_v50  ;;  %v2178_v34 = vld [vmem:[%s3069_s2 + $0xb4] sm:$0xf0]  ;;  %v2174_v35 = vld [vmem:[%s3069_s2 + $0x9c] sm:$0xf]  ;;  %v1598_v37 = vor.u32 %v2177_v28, %v1597_v27  ;;  %v1602_v38 = vor.u32 %v2173_v29, %v1599_v31  ;;  %v1565_v39 = vld [vmem:[%s3069_s2 + $0x50] sm:$0xf] }
  0x32   :  { %563 = vmatpush.bf16.msrb.mxu3 %v1770_v47  ;;  %506 = vmatmul.bf16.vlgmr.msra.gmra.mxu2 %v2684_v50  ;;  %v1607_v36 = vld [vmem:[%s3069_s2 + $0xb8] sm:$0xf0]  ;;  %v1606_v40 = vor.u32 %v2178_v34, %v1605_v33  ;;  %v2169_v41 = vld [vmem:[%s3069_s2 + $0x6c] sm:$0xf0]  ;;  %v2165_v42 = vld [vmem:[%s3069_s2 + $0x54] sm:$0xf] }
  0x33   :  { %v1567_v43 = vld [vmem:[%s3069_s2 + $0x70] sm:$0xf0]  ;;  %v1610_v44 = vor.u32 %v2174_v35, %v1607_v36  ;;  %v1573_v45 = vld [vmem:[%s3069_s2 + $0x58] sm:$0xf]  ;;  %v2166_v47 = vld [vmem:[%s3069_s2 + $0x5c] sm:$0xf]  ;;  %v1566_v49 = vor.u32 %v2169_v41, %v1565_v39 }
  0x34   :  { %525 = vmatpush.bf16.msrb.mxu0 %v1726_v53  ;;  %538 = vmatpush.bf16.msrb.mxu1 %v1730_v54  ;;  %v2170_v46 = vld [vmem:[%s3069_s2 + $0x74] sm:$0xf0]  ;;  %v1575_v48 = vld [vmem:[%s3069_s2 + $0x78] sm:$0xf0]  ;;  %v1570_v51 = vor.u32 %v2165_v42, %v1567_v43  ;;  %v1533_v52 = vld [vmem:[%s3069_s2 + $0x10] sm:$0xf] }
  0x35   :  { %551 = vmatpush.bf16.msrb.mxu2 %v1734_v56  ;;  %v1574_v53 = vor.u32 %v2170_v46, %v1573_v45  ;;  %v2161_v54 = vld [vmem:[%s3069_s2 + $0x2c] sm:$0xf0]  ;;  %v2157_v55 = vld [vmem:[%s3069_s2 + $0x14] sm:$0xf]  ;;  %v1578_v57 = vor.u32 %v2166_v47, %v1575_v48  ;;  %v1541_v58 = vld [vmem:[%s3069_s2 + $0x18] sm:$0xf] }
  0x36   :  { %564 = vmatpush.bf16.msrb.mxu3 %v1738_v60  ;;  %v1535_v56 = vld [vmem:[%s3069_s2 + $0x30] sm:$0xf0]  ;;  %v2162_v59 = vld [vmem:[%s3069_s2 + $0x34] sm:$0xf0]  ;;  %v2158_v60 = vld [vmem:[%s3069_s2 + $0x1c] sm:$0xf]  ;;  %v1534_v62 = vor.u32 %v2161_v54, %v1533_v52 }
  0x37   :  { %v1543_v61 = vld [vmem:[%s3069_s2 + $0x38] sm:$0xf0]  ;;  %v1538_v63 = vor.u32 %v2157_v55, %v1535_v56  ;;  %v1542_v0 = vor.u32 %v2162_v59, %v1541_v58  ;;  %v2225_v5 = vld [vmem:[%s3071_s4 + $0x30] sm:$0xff]  ;;  %v2224_v9 = vld [vmem:[%s3071_s4 + $0x28] sm:$0xff] }
  0x38   :  { %526 = vmatpush.bf16.msrb.mxu0 %v1694_v1  ;;  %539 = vmatpush.bf16.msrb.mxu1 %v1698_v2  ;;  %v2226_v1 = vld [vmem:[%s3071_s4 + $0x38] sm:$0xff]  ;;  %v1546_v2 = vor.u32 %v2158_v60, %v1543_v61  ;;  %v2233_v6 = vld [vmem:[%s3071_s4 + $0x70] sm:$0xff]  ;;  %v2232_v10 = vld [vmem:[%s3071_s4 + $0x68] sm:$0xff] }
  0x39   :  { %552 = vmatpush.bf16.msrb.mxu2 %v1702_v4  ;;  %v2234_v3 = vld [vmem:[%s3071_s4 + $0x78] sm:$0xff]  ;;  %v2241_v11 = vld [vmem:[%s3071_s4 + $0xb0] sm:$0xff]  ;;  %v2223_v12 = vld [vmem:[%s3071_s4 + $0x20] sm:$0xff] }
  0x3a   :  { %565 = vmatpush.bf16.msrb.mxu3 %v1706_v8  ;;  %v2250_v4 = vld [vmem:[%s3071_s4 + $0xf8] sm:$0xff]  ;;  %v2249_v8 = vld [vmem:[%s3071_s4 + $0xf0] sm:$0xff]  ;;  %v2247_v15 = vld [vmem:[%s3071_s4 + $0xe0] sm:$0xff] }
  0x3b   :  { %v2242_v7 = vld [vmem:[%s3071_s4 + $0xb8] sm:$0xff]  ;;  %v2239_v18 = vld [vmem:[%s3071_s4 + $0xa0] sm:$0xff]  ;;  %v2229_v21 = vld [vmem:[%s3071_s4 + $0x50] sm:$0xff] }
  0x3c   :  { %527 = vmatpush.bf16.msrb.mxu0 %v1662_v13  ;;  %540 = vmatpush.bf16.msrb.mxu1 %v1666_v14  ;;  %v2231_v13 = vld [vmem:[%s3071_s4 + $0x60] sm:$0xff]  ;;  %v2240_v14 = vld [vmem:[%s3071_s4 + $0xa8] sm:$0xff]  ;;  %v2230_v17 = vld [vmem:[%s3071_s4 + $0x58] sm:$0xff] }
  0x3d   :  { %553 = vmatpush.bf16.msrb.mxu2 %v1670_v16  ;;  %v2222_v16 = vld [vmem:[%s3071_s4 + $0x18] sm:$0xff]  ;;  %v2245_v23 = vld [vmem:[%s3071_s4 + $0xd0] sm:$0xff]  ;;  %v2220_v24 = vld [vmem:[%s3071_s4 + $0x8] sm:$0xff] }
  0x3e   :  { %566 = vmatpush.bf16.msrb.mxu3 %v1674_v20  ;;  %v2246_v19 = vld [vmem:[%s3071_s4 + $0xd8] sm:$0xff]  ;;  %v2221_v20 = vld [vmem:[%s3071_s4 + $0x10] sm:$0xff]  ;;  %v2219_v27 = vld [vmem:[%s3071_s4] sm:$0xff] }
  0x3f   :  { %v2238_v22 = vld [vmem:[%s3071_s4 + $0x98] sm:$0xff]  ;;  %v2227_v28 = vld [vmem:[%s3071_s4 + $0x40] sm:$0xff]  ;;  %v2257_v31 = vld [vmem:[%s3071_s4 + $0x130] sm:$0xff] }
  0x40   :  { %528 = vmatpush.bf16.msrb.mxu0 %v1630_v25  ;;  %541 = vmatpush.bf16.msrb.mxu1 %v1634_v26  ;;  %v2228_v25 = vld [vmem:[%s3071_s4 + $0x48] sm:$0xff]  ;;  %v2237_v26 = vld [vmem:[%s3071_s4 + $0x90] sm:$0xff]  ;;  %v2258_v29 = vld [vmem:[%s3071_s4 + $0x138] sm:$0xff] }
  0x41   :  { %554 = vmatpush.bf16.msrb.mxu2 %v1638_v30  ;;  %v2266_v30 = vld [vmem:[%s3071_s4 + $0x178] sm:$0xff]  ;;  %v2256_v33 = vld [vmem:[%s3071_s4 + $0x128] sm:$0xff]  ;;  %v2255_v35 = vld [vmem:[%s3071_s4 + $0x120] sm:$0xff] }
  0x42   :  { %567 = vmatpush.bf16.msrb.mxu3 %v1642_v32  ;;  %v2265_v32 = vld [vmem:[%s3071_s4 + $0x170] sm:$0xff]  ;;  %v2264_v34 = vld [vmem:[%s3071_s4 + $0x168] sm:$0xff]  ;;  %v2263_v36 = vld [vmem:[%s3071_s4 + $0x160] sm:$0xff] }
  0x43   :  { %v2254_v39 = vld [vmem:[%s3071_s4 + $0x118] sm:$0xff]  ;;  %v2235_v41 = vld [vmem:[%s3071_s4 + $0x80] sm:$0xff]  ;;  %v2261_v45 = vld [vmem:[%s3071_s4 + $0x150] sm:$0xff] }
  0x44   :  { %529 = vmatpush.bf16.msrb.mxu0 %v1598_v37  ;;  %542 = vmatpush.bf16.msrb.mxu1 %v1602_v38  ;;  %v2236_v37 = vld [vmem:[%s3071_s4 + $0x88] sm:$0xff]  ;;  %v2274_v42 = vld [vmem:[%s3071_s4 + $0x1b8] sm:$0xff]  ;;  %v2243_v43 = vld [vmem:[%s3071_s4 + $0xc0] sm:$0xff] }
  0x45   :  { %555 = vmatpush.bf16.msrb.mxu2 %v1606_v40  ;;  %v2244_v38 = vld [vmem:[%s3071_s4 + $0xc8] sm:$0xff]  ;;  %v2262_v40 = vld [vmem:[%s3071_s4 + $0x158] sm:$0xff]  ;;  %v2273_v47 = vld [vmem:[%s3071_s4 + $0x1b0] sm:$0xff] }
  0x46   :  { %568 = vmatpush.bf16.msrb.mxu3 %v1610_v44  ;;  %v2253_v44 = vld [vmem:[%s3071_s4 + $0x110] sm:$0xff]  ;;  %v2282_v46 = vld [vmem:[%s3071_s4 + $0x1f8] sm:$0xff]  ;;  %v2252_v48 = vld [vmem:[%s3071_s4 + $0x108] sm:$0xff] }
  0x47   :  { %v2272_v52 = vld [vmem:[%s3071_s4 + $0x1a8] sm:$0xff]  ;;  %v2259_v54 = vld [vmem:[%s3071_s4 + $0x140] sm:$0xff]  ;;  %v2270_v58 = vld [vmem:[%s3071_s4 + $0x198] sm:$0xff] }
  0x48   :  { %530 = vmatpush.bf16.msrb.mxu0 %v1566_v49  ;;  %543 = vmatpush.bf16.msrb.mxu1 %v1570_v51  ;;  %v2260_v49 = vld [vmem:[%s3071_s4 + $0x148] sm:$0xff]  ;;  %v2281_v51 = vld [vmem:[%s3071_s4 + $0x1f0] sm:$0xff]  ;;  %v2271_v56 = vld [vmem:[%s3071_s4 + $0x1a0] sm:$0xff] }
  0x49   :  { %556 = vmatpush.bf16.msrb.mxu2 %v1574_v53  ;;  %v2251_v53 = vld [vmem:[%s3071_s4 + $0x100] sm:$0xff]  ;;  %v2280_v55 = vld [vmem:[%s3071_s4 + $0x1e8] sm:$0xff]  ;;  %v2278_v60 = vld [vmem:[%s3071_s4 + $0x1d8] sm:$0xff] }
  0x4a   :  { %569 = vmatpush.bf16.msrb.mxu3 %v1578_v57  ;;  %v2279_v57 = vld [vmem:[%s3071_s4 + $0x1e0] sm:$0xff] }
  0x4b   :  { %v3018_v59 = vld [vmem:[%s3070_s3] sm:$0xff] }
  0x4c   :  { %531 = vmatpush.bf16.msrb.mxu0 %v1534_v62  ;;  %544 = vmatpush.bf16.msrb.mxu1 %v1538_v63  ;;  %v136_v61 = vperm.slane %v3018_v59, 0  ;;  %v137_v62 = vperm.slane %v3018_v59, 1  ;;  %v2269_v63 = vld [vmem:[%s3071_s4 + $0x190] sm:$0xff] }
  0x4d   :  { %557 = vmatpush.bf16.msrb.mxu2 %v1542_v0  ;;  %v2277_v0 = vld [vmem:[%s3071_s4 + $0x1d0] sm:$0xff] }
  0x4e   :  { %570 = vmatpush.bf16.msrb.mxu3 %v1546_v2 }
  0x4f   :  { %532 = vmatmul.bf16.vlgmr.msrb.gmra.mxu0 %v2684_v50  ;;  %545 = vmatmul.bf16.vlgmr.msrb.gmra.mxu1 %v2684_v50 }
  0x50   :  { %1108 = vmatpush.bf16.msra.mxu0 %v2226_v1  ;;  %1121 = vmatpush.bf16.msra.mxu1 %v2234_v3  ;;  %v2085_v3 = vld [vmem:[#allocation2 + $0x70] sm:$0xf] }
  0x51   :  { %558 = vmatmul.bf16.vlgmr.msrb.gmra.mxu2 %v2684_v50  ;;  %571 = vmatmul.bf16.vlgmr.msrb.gmra.mxu3 %v2684_v50  ;;  %v2248_v50 = vld [vmem:[%s3071_s4 + $0xe8] sm:$0xff] }
  0x52   :  { %1147 = vmatpush.bf16.msra.mxu3 %v2250_v4  ;;  %1134 = vmatpush.bf16.msra.mxu2 %v2242_v7  ;;  %v2298_v4 = vld [vmem:[#allocation2 + $0x74] sm:$0xf0]  ;;  %v2297_v7 = vld [vmem:[#allocation2 + $0x74] sm:$0xf] }
  0x54   :  { %1109 = vmatpush.bf16.msra.mxu0 %v2225_v5  ;;  %1122 = vmatpush.bf16.msra.mxu1 %v2233_v6 }
  0x56   :  { %1148 = vmatpush.bf16.msra.mxu3 %v2249_v8  ;;  %1135 = vmatpush.bf16.msra.mxu2 %v2241_v11  ;;  %v2087_v8 = vld [vmem:[#allocation2 + $0x78] sm:$0xf0] }
  0x58   :  { %1110 = vmatpush.bf16.msra.mxu0 %v2224_v9  ;;  %1123 = vmatpush.bf16.msra.mxu1 %v2232_v10  ;;  %v2268_v9 = vld [vmem:[%s3071_s4 + $0x188] sm:$0xff]  ;;  %v138_v10 = vperm.slane %v3018_v59, 2 }
  0x5a   :  { %1149 = vmatpush.bf16.msra.mxu3 %v2248_v50  ;;  %1136 = vmatpush.bf16.msra.mxu2 %v2240_v14  ;;  %v2090_v14 = vor.u32 %v2297_v7, %v2087_v8 }
  0x5c   :  { %1111 = vmatpush.bf16.msra.mxu0 %v2223_v12  ;;  %1124 = vmatpush.bf16.msra.mxu1 %v2231_v13  ;;  %v2276_v12 = vld [vmem:[%s3071_s4 + $0x1c8] sm:$0xff]  ;;  %v2086_v13 = vor.u32 %v2298_v4, %v2085_v3  ;;  %v2286_v3 = vld [vmem:[#allocation2 + $0x14] sm:$0xf0]  ;;  %v2285_v4 = vld [vmem:[#allocation2 + $0x14] sm:$0xf] }
  0x5e   :  { %1150 = vmatpush.bf16.msra.mxu3 %v2247_v15  ;;  %1137 = vmatpush.bf16.msra.mxu2 %v2239_v18  ;;  %v139_v18 = vperm.slane %v3018_v59, 3 }
  0x60   :  { %1112 = vmatpush.bf16.msra.mxu0 %v2222_v16  ;;  %1125 = vmatpush.bf16.msra.mxu1 %v2230_v17 }
  0x62   :  { %1151 = vmatpush.bf16.msra.mxu3 %v2246_v19  ;;  %1138 = vmatpush.bf16.msra.mxu2 %v2238_v22  ;;  %v2077_v19 = vld [vmem:[#allocation2 + $0x60] sm:$0xf] }
  0x64   :  { %1113 = vmatpush.bf16.msra.mxu0 %v2221_v20  ;;  %1126 = vmatpush.bf16.msra.mxu1 %v2229_v21  ;;  %v2296_v20 = vld [vmem:[#allocation2 + $0x64] sm:$0xf0]  ;;  %v2267_v21 = vld [vmem:[%s3071_s4 + $0x180] sm:$0xff] }
  0x66   :  { %1152 = vmatpush.bf16.msra.mxu3 %v2245_v23  ;;  %1139 = vmatpush.bf16.msra.mxu2 %v2237_v26  ;;  %v2295_v23 = vld [vmem:[#allocation2 + $0x64] sm:$0xf] }
  0x68   :  { %1114 = vmatpush.bf16.msra.mxu0 %v2220_v24  ;;  %1127 = vmatpush.bf16.msra.mxu1 %v2228_v25  ;;  %v2079_v24 = vld [vmem:[#allocation2 + $0x68] sm:$0xf0]  ;;  %v2275_v25 = vld [vmem:[%s3071_s4 + $0x1c0] sm:$0xff] }
  0x6a   :  { %1140 = vmatpush.bf16.msra.mxu2 %v2236_v37  ;;  %1153 = vmatpush.bf16.msra.mxu3 %v2244_v38  ;;  %v2071_v37 = vld [vmem:[#allocation2 + $0x58] sm:$0xf0] }
  0x6c   :  { %1115 = vmatpush.bf16.msra.mxu0 %v2219_v27  ;;  %1128 = vmatpush.bf16.msra.mxu1 %v2227_v28 }
  0x6e   :  { %1141 = vmatpush.bf16.msra.mxu2 %v2235_v41  ;;  %1154 = vmatpush.bf16.msra.mxu3 %v2243_v43  ;;  %v2061_v43 = vld [vmem:[#allocation2 + $0x40] sm:$0xf] }
  0x70   :  { %1160 = vmatpush.bf16.msrb.mxu0 %v2258_v29  ;;  %1173 = vmatpush.bf16.msrb.mxu1 %v2266_v30  ;;  %v2078_v29 = vor.u32 %v2296_v20, %v2077_v19 }
  0x72   :  { %1186 = vmatpush.bf16.msrb.mxu2 %v2274_v42  ;;  %1199 = vmatpush.bf16.msrb.mxu3 %v2282_v46  ;;  %v2063_v46 = vld [vmem:[#allocation2 + $0x48] sm:$0xf0] }
  0x74   :  { %1161 = vmatpush.bf16.msrb.mxu0 %v2257_v31  ;;  %1174 = vmatpush.bf16.msrb.mxu1 %v2265_v32  ;;  %v2082_v32 = vor.u32 %v2295_v23, %v2079_v24 }
  0x76   :  { %1187 = vmatpush.bf16.msrb.mxu2 %v2273_v47  ;;  %1200 = vmatpush.bf16.msrb.mxu3 %v2281_v51  ;;  %v2053_v51 = vld [vmem:[#allocation2 + $0x30] sm:$0xf] }
  0x78   :  { %1162 = vmatpush.bf16.msrb.mxu0 %v2256_v33  ;;  %1175 = vmatpush.bf16.msrb.mxu1 %v2264_v34  ;;  %v2069_v33 = vld [vmem:[#allocation2 + $0x50] sm:$0xf]  ;;  %v2294_v34 = vld [vmem:[#allocation2 + $0x54] sm:$0xf0] }
  0x7a   :  { %1188 = vmatpush.bf16.msrb.mxu2 %v2272_v52  ;;  %1201 = vmatpush.bf16.msrb.mxu3 %v2280_v55  ;;  %v2290_v52 = vld [vmem:[#allocation2 + $0x34] sm:$0xf0] }
  0x7b   :  { %v2054_v55 = vor.u32 %v2290_v52, %v2053_v51 }
  0x7c   :  { %1163 = vmatpush.bf16.msrb.mxu0 %v2255_v35  ;;  %1176 = vmatpush.bf16.msrb.mxu1 %v2263_v36  ;;  %v2293_v36 = vld [vmem:[#allocation2 + $0x54] sm:$0xf] }
  0x7d   :  { %v2074_v42 = vor.u32 %v2293_v36, %v2071_v37  ;;  %v2314_v36 = vld [vmem:[#allocation4 + $0x78] sm:$0xff]  ;;  %v2305_v37 = vld [vmem:[#allocation4 + $0x30] sm:$0xff] }
  0x7e   :  { %1189 = vmatpush.bf16.msrb.mxu2 %v2271_v56  ;;  %1202 = vmatpush.bf16.msrb.mxu3 %v2279_v57  ;;  %v2045_v57 = vld [vmem:[#allocation2 + $0x20] sm:$0xf] }
  0x80   :  { %1164 = vmatpush.bf16.msrb.mxu0 %v2254_v39  ;;  %1177 = vmatpush.bf16.msrb.mxu1 %v2262_v40  ;;  %v2070_v39 = vor.u32 %v2294_v34, %v2069_v33 }
  0x82   :  { %1190 = vmatpush.bf16.msrb.mxu2 %v2270_v58  ;;  %1203 = vmatpush.bf16.msrb.mxu3 %v2278_v60  ;;  %v2288_v58 = vld [vmem:[#allocation2 + $0x24] sm:$0xf0]  ;;  %v2287_v60 = vld [vmem:[#allocation2 + $0x24] sm:$0xf] }
  0x84   :  { %1165 = vmatpush.bf16.msrb.mxu0 %v2253_v44  ;;  %1178 = vmatpush.bf16.msrb.mxu1 %v2261_v45  ;;  %v2292_v44 = vld [vmem:[#allocation2 + $0x44] sm:$0xf0]  ;;  %v2291_v45 = vld [vmem:[#allocation2 + $0x44] sm:$0xf] }
  0x86   :  { %1191 = vmatpush.bf16.msrb.mxu2 %v2269_v63  ;;  %1204 = vmatpush.bf16.msrb.mxu3 %v2277_v0  ;;  %v140_v63 = vperm.slane %v3018_v59, 4  ;;  %v141_v0 = vperm.slane %v3018_v59, 5 }
  0x88   :  { %1166 = vmatpush.bf16.msrb.mxu0 %v2252_v48  ;;  %1179 = vmatpush.bf16.msrb.mxu1 %v2260_v49  ;;  %v2062_v48 = vor.u32 %v2292_v44, %v2061_v43  ;;  %v2066_v49 = vor.u32 %v2291_v45, %v2063_v46  ;;  %v2302_v45 = vld [vmem:[#allocation4 + $0x18] sm:$0xff] }
  0x89   :  { %v2310_v46 = vld [vmem:[#allocation4 + $0x58] sm:$0xff] }
  0x8a   :  { %1192 = vmatpush.bf16.msrb.mxu2 %v2268_v9  ;;  %1205 = vmatpush.bf16.msrb.mxu3 %v2276_v12  ;;  %v2284_v12 = vld [vmem:[#allocation2 + $0x4] sm:$0xf0] }
  0x8c   :  { %1167 = vmatpush.bf16.msrb.mxu0 %v2251_v53  ;;  %1180 = vmatpush.bf16.msrb.mxu1 %v2259_v54  ;;  %v2289_v53 = vld [vmem:[#allocation2 + $0x34] sm:$0xf]  ;;  %v2055_v54 = vld [vmem:[#allocation2 + $0x38] sm:$0xf0] }
  0x8d   :  { %v2058_v56 = vor.u32 %v2289_v53, %v2055_v54  ;;  %v2300_v53 = vld [vmem:[#allocation4 + $0x8] sm:$0xff] }
  0x8e   :  { %1193 = vmatpush.bf16.msrb.mxu2 %v2267_v21  ;;  %1206 = vmatpush.bf16.msrb.mxu3 %v2275_v25  ;;  %v2308_v54 = vld [vmem:[#allocation4 + $0x48] sm:$0xff] }
  0xac   :  { %v481_v1 = vpop.f32.mrf.mxu0  ;;  %v494_v2 = vpop.f32.mrf.mxu1 }
  0xad   :  { %v482_v5 = vadd.f32 %v481_v1, %v136_v61  ;;  %v495_v6 = vadd.f32 %v494_v2, %v137_v62  ;;  %v2047_v61 = vld [vmem:[#allocation2 + $0x28] sm:$0xf0]  ;;  %v2046_v62 = vor.u32 %v2288_v58, %v2045_v57  ;;  %v2037_v2 = vld [vmem:[#allocation2 + $0x10] sm:$0xf]  ;;  %v2307_v57 = vld [vmem:[#allocation4 + $0x40] sm:$0xff] }
  0xae   :  { %v2050_v1 = vor.u32 %v2287_v60, %v2047_v61  ;;  %v2038_v8 = vor.u32 %v2286_v3, %v2037_v2  ;;  %v2321_v58 = vld [vmem:[%s3072_s5] ss:$0 sm:$0xff] }
  0xaf   :  { %v576_v11 = vmax.f32 %v482_v5, 0.0  ;;  %v577_v50 = vmax.f32 %v495_v6, 0.0  ;;  %v2039_v5 = vld [vmem:[#allocation2 + $0x18] sm:$0xf0] }
  0xb1   :  { %v584_v15 = vpack.c.bf16 %v576_v11, %v576_v11  ;;  %v585_v16 = vpack.c.bf16 %v577_v50, %v577_v50  ;;  %v2042_v11 = vor.u32 %v2285_v4, %v2039_v5  ;;  %v2029_v50 = vld [vmem:[#allocation2] sm:$0xf] }
  0xb3   :  { %1116 = vmatmul.bf16.vlgmr.msra.gmra.mxu0 %v584_v15  ;;  %1129 = vmatmul.bf16.vlgmr.msra.gmra.mxu1 %v585_v16 }
  0xb4   :  { %v520_v27 = vpop.f32.mrf.mxu3  ;;  %v483_v28 = vpop.f32.mrf.mxu0  ;;  %1316 = vmatpush.bf16.msra.mxu0 %v2086_v13  ;;  %1329 = vmatpush.bf16.msra.mxu1 %v2090_v14  ;;  %v2283_v13 = vld [vmem:[#allocation2 + $0x4] sm:$0xf]  ;;  %v2031_v14 = vld [vmem:[#allocation2 + $0x8] sm:$0xf0] }
  0xb5   :  { %v507_v17 = vpop.f32.mrf.mxu2  ;;  %v521_v30 = vadd.f32 %v520_v27, %v139_v18  ;;  %v496_v31 = vpop.f32.mrf.mxu1  ;;  %v2030_v18 = vor.u32 %v2284_v12, %v2029_v50  ;;  %v2034_v21 = vor.u32 %v2283_v13, %v2031_v14 }
  0xb6   :  { %v508_v22 = vadd.f32 %v507_v17, %v138_v10  ;;  %v142_v17 = vperm.slane %v3018_v59, 6 }
  0xb7   :  { %v579_v38 = vmax.f32 %v521_v30, 0.0 }
  0xb8   :  { %v578_v26 = vmax.f32 %v508_v22, 0.0  ;;  %1317 = vmatpush.bf16.msra.mxu0 %v2078_v29  ;;  %1330 = vmatpush.bf16.msra.mxu1 %v2082_v32  ;;  %v143_v22 = vperm.slane %v3018_v59, 7  ;;  %v1213_v59 = vld [vmem:[%s3068_s1] sm:$0xf] }
  0xb9   :  { %v587_v40 = vpack.c.bf16 %v579_v38, %v579_v38  ;;  %v2313_v38 = vld [vmem:[#allocation4 + $0x70] sm:$0xff] }
  0xba   :  { %v586_v35 = vpack.c.bf16 %v578_v26, %v578_v26 }
  0xbb   :  { %1155 = vmatmul.bf16.vlgmr.msra.gmra.mxu3 %v587_v40  ;;  %v2312_v40 = vld [vmem:[#allocation4 + $0x68] sm:$0xff] }
  0xbc   :  { %1142 = vmatmul.bf16.vlgmr.msra.gmra.mxu2 %v586_v35  ;;  %v522_v47 = vpop.f32.mrf.mxu3  ;;  %1318 = vmatpush.bf16.msra.mxu0 %v2070_v39  ;;  %v2306_v35 = vld [vmem:[#allocation4 + $0x38] sm:$0xff]  ;;  %v2304_v39 = vld [vmem:[#allocation4 + $0x28] sm:$0xff] }
  0xbd   :  { %v509_v41 = vpop.f32.mrf.mxu2  ;;  %1331 = vmatpush.bf16.msra.mxu1 %v2074_v42  ;;  %1478 = vmatpush.bf16.msra.mxu2 %v2306_v35  ;;  %v2311_v42 = vld [vmem:[#allocation4 + $0x60] sm:$0xff]  ;;  %v2301_v47 = vld [vmem:[#allocation4 + $0x10] sm:$0xff] }
  0xbe   :  { %1491 = vmatpush.bf16.msra.mxu3 %v2314_v36  ;;  %v2303_v41 = vld [vmem:[#allocation4 + $0x20] sm:$0xff] }
  0xc0   :  { %1319 = vmatpush.bf16.msra.mxu0 %v2062_v48  ;;  %v2309_v48 = vld [vmem:[#allocation4 + $0x50] sm:$0xff] }
  0xc1   :  { %1332 = vmatpush.bf16.msra.mxu1 %v2066_v49  ;;  %1479 = vmatpush.bf16.msra.mxu2 %v2305_v37 }
  0xc2   :  { %1492 = vmatpush.bf16.msra.mxu3 %v2313_v38 }
  0xc4   :  { %1320 = vmatpush.bf16.msra.mxu0 %v2054_v55 }
  0xc5   :  { %1333 = vmatpush.bf16.msra.mxu1 %v2058_v56  ;;  %1480 = vmatpush.bf16.msra.mxu2 %v2304_v39  ;;  %v2299_v56 = vld [vmem:[#allocation4] sm:$0xff] }
  0xc6   :  { %1493 = vmatpush.bf16.msra.mxu3 %v2312_v40 }
  0xc8   :  { %1321 = vmatpush.bf16.msra.mxu0 %v2046_v62 }
  0xc9   :  { %1334 = vmatpush.bf16.msra.mxu1 %v2050_v1  ;;  %1481 = vmatpush.bf16.msra.mxu2 %v2303_v41 }
  0xca   :  { %1494 = vmatpush.bf16.msra.mxu3 %v2311_v42 }
  0xcc   :  { %v533_v6 = vpop.f32.mrf.mxu0  ;;  %v546_v7 = vpop.f32.mrf.mxu1  ;;  %1322 = vmatpush.bf16.msra.mxu0 %v2038_v8 }
  0xcd   :  { %v534_v9 = vadd.f32 %v533_v6, %v140_v63  ;;  %v547_v10 = vadd.f32 %v546_v7, %v141_v0  ;;  %1335 = vmatpush.bf16.msra.mxu1 %v2042_v11  ;;  %1482 = vmatpush.bf16.msra.mxu2 %v2302_v45  ;;  %v1230_v7 = vld [vmem:[%s3074_s7] sm:$0x3] }
  0xce   :  { %1495 = vmatpush.bf16.msra.mxu3 %v2310_v46  ;;  %v1233_v11 = vperm.slane %v1230_v7, 1 }
  0xcf   :  { %v580_v15 = vmax.f32 %v534_v9, 0.0  ;;  %v581_v16 = vmax.f32 %v547_v10, 0.0  ;;  %v1232_v10 = vperm.slane %v1230_v7, 0 }
  0xd0   :  { %1323 = vmatpush.bf16.msra.mxu0 %v2030_v18 }
  0xd1   :  { %v588_v19 = vpack.c.bf16 %v580_v15, %v580_v15  ;;  %v589_v20 = vpack.c.bf16 %v581_v16, %v581_v16  ;;  %1336 = vmatpush.bf16.msra.mxu1 %v2034_v21  ;;  %1483 = vmatpush.bf16.msra.mxu2 %v2301_v47 }
  0xd2   :  { %1496 = vmatpush.bf16.msra.mxu3 %v2309_v48 }
  0xd3   :  { %1168 = vmatmul.bf16.vlgmr.msrb.gmra.mxu0 %v588_v19  ;;  %1181 = vmatmul.bf16.vlgmr.msrb.gmra.mxu1 %v589_v20 }
  0xd4   :  { %v559_v23 = vpop.f32.mrf.mxu2  ;;  %v535_v25 = vpop.f32.mrf.mxu0 }
  0xd5   :  { %v560_v24 = vadd.f32 %v559_v23, %v142_v17  ;;  %v548_v26 = vpop.f32.mrf.mxu1  ;;  %v572_v27 = vpop.f32.mrf.mxu3  ;;  %1484 = vmatpush.bf16.msra.mxu2 %v2300_v53 }
  0xd6   :  { %v573_v29 = vadd.f32 %v572_v27, %v143_v22  ;;  %1497 = vmatpush.bf16.msra.mxu3 %v2308_v54  ;;  %v2322_v26 = vld [vmem:[%s3076_s9] ss:$0 sm:$0xff] }
  0xd7   :  { %v582_v28 = vmax.f32 %v560_v24, 0.0 }
  0xd8   :  { %v583_v31 = vmax.f32 %v573_v29, 0.0 }
  0xd9   :  { %v590_v30 = vpack.c.bf16 %v582_v28, %v582_v28  ;;  %1485 = vmatpush.bf16.msra.mxu2 %v2299_v56 }
  0xda   :  { %v591_v32 = vpack.c.bf16 %v583_v31, %v583_v31  ;;  %1498 = vmatpush.bf16.msra.mxu3 %v2307_v57 }
  0xdb   :  { %1194 = vmatmul.bf16.vlgmr.msrb.gmra.mxu2 %v590_v30 }
  0xdc   :  { %v561_v33 = vpop.f32.mrf.mxu2  ;;  %1207 = vmatmul.bf16.vlgmr.msrb.gmra.mxu3 %v591_v32 }
  0xdd   :  { %v574_v34 = vpop.f32.mrf.mxu3 }
  0xe3   :  { %1324 = vmatmul.bf16.vlgmr.msra.gmra.mxu0 %v1213_v59  ;;  %1337 = vmatmul.bf16.vlgmr.msra.gmra.mxu1 %v1213_v59 }
 0x130   :  { %v1117_v43 = vpop.f32.mrf.mxu0  ;;  %v1130_v44 = vpop.f32.mrf.mxu1 }
 0x131   :  { %v1118_v61 = vadd.f32 %v2321_v58, %v1117_v43 }
 0x133   :  { %v1131_v63 = vadd.f32 %v1130_v44, %v1118_v61 }
 0x138   :  { %v1119_v49 = vpop.f32.mrf.mxu0  ;;  %v1132_v51 = vpop.f32.mrf.mxu1 }
 0x13e   :  { %v1156_v55 = vpop.f32.mrf.mxu3 }
 0x13f   :  { %v1143_v52 = vpop.f32.mrf.mxu2 }
 0x140   :  { %v1144_v2 = vadd.f32 %v1143_v52, %v1131_v63 }
 0x142   :  { %v1157_v3 = vadd.f32 %v1156_v55, %v1144_v2 }
 0x146   :  { %v1158_v62 = vpop.f32.mrf.mxu3 }
 0x147   :  { %v1145_v60 = vpop.f32.mrf.mxu2 }
 0x150   :  { %v1169_v0 = vpop.f32.mrf.mxu0  ;;  %v1182_v1 = vpop.f32.mrf.mxu1 }
 0x151   :  { %v1170_v4 = vadd.f32 %v1169_v0, %v1157_v3 }
 0x153   :  { %v1183_v8 = vadd.f32 %v1182_v1, %v1170_v4 }
 0x158   :  { %v1171_v5 = vpop.f32.mrf.mxu0  ;;  %v1184_v6 = vpop.f32.mrf.mxu1 }
 0x15e   :  { %v1195_v9 = vpop.f32.mrf.mxu2 }
 0x15f   :  { %v1196_v50 = vadd.f32 %v1195_v9, %v1183_v8  ;;  %v1208_v12 = vpop.f32.mrf.mxu3 }
 0x160   :  { %v1325_v14 = vpop.f32.mrf.mxu0  ;;  %v1338_v15 = vpop.f32.mrf.mxu1 }
 0x161   :  { %v1209_v13 = vadd.f32 %v1208_v12, %v1196_v50  ;;  %v1326_v16 = vadd.f32 %v1325_v14, %v1232_v10  ;;  %v1339_v17 = vadd.f32 %v1338_v15, %v1233_v11 }
 0x163   :  { %1212 = vst [vmem:[%s3077_s10] sm:$0xff] %v1209_v13  ;;  %v1342_v18 = vmax.f32 %v1326_v16, 0.0  ;;  %v1343_v19 = vmax.f32 %v1339_v17, 0.0 }
 0x165   :  { %v1344_v20 = vpack.c.bf16 %v1342_v18, %v1342_v18  ;;  %v1345_v21 = vpack.c.bf16 %v1343_v19, %v1343_v19 }
 0x166   :  { %v1197_v22 = vpop.f32.mrf.mxu2 }
 0x167   :  { %1486 = vmatmul.bf16.vlgmr.msra.gmra.mxu2 %v1344_v20  ;;  %1499 = vmatmul.bf16.vlgmr.msra.gmra.mxu3 %v1345_v21  ;;  %v1210_v23 = vpop.f32.mrf.mxu3 }
 0x168   :  { %v1327_v24 = vpop.f32.mrf.mxu0  ;;  %v1340_v25 = vpop.f32.mrf.mxu1 }
 0x1ea   :  { %v1487_v27 = vpop.f32.mrf.mxu2  ;;  %v1500_v28 = vpop.f32.mrf.mxu3 }
 0x1eb   :  { %v1488_v29 = vadd.f32 %v2322_v26, %v1487_v27 }
 0x1ed   :  { %v1501_v30 = vadd.f32 %v1500_v28, %v1488_v29 }
 0x1ef   :  { %1504 = vst [vmem:[%s3078_s11] sm:$0xff] %v1501_v30 }
 0x1f2   :  { %v1489_v31 = vpop.f32.mrf.mxu2  ;;  %v1502_v32 = vpop.f32.mrf.mxu3 }
 0x1f3   :  { %1513 = vsyncpa [#allocation3], 1 }
 0x1f4   :  { %1514 = vsyncpa [#allocation5], 1 }

</bundles_post_ra>
